<compile_context>
chip_gen: v7x
topology: tpu7x:2x2x1
jax: 0.10.0
libtpu: 0.0.40
codegen_flags: <defaults>
</compile_context>

<pallas_src>
import functools

import jax
import jax.numpy as jnp
from jax.experimental import pallas as pl
from jax.experimental.pallas import tpu as pltpu

_LANES = 128
_SUBLANES = 8
_FAST_PATH_ELEMS = 1024  # below this, a pallas_call launch costs more than the work


def _round_up(x: int, m: int) -> int:
    return (x + m - 1) // m * m


def _elementwise_loss(d, loss_type, delta):
    """Elementwise loss on an f32 difference tensor (used in-kernel and in wrapper)."""
    if loss_type == "mse":
        return d * d
    if loss_type == "mae":
        return jnp.abs(d)
    # huber via the select-free identity: m*(|d| - 0.5*m)/delta, m = min(|d|, delta)
    #   |d| <  delta -> 0.5*d^2/delta ;  |d| >= delta -> |d| - 0.5*delta
    ad = jnp.abs(d)
    m = jnp.minimum(ad, delta)
    return m * (ad - 0.5 * m) * (1.0 / delta)


def _device_kind() -> str:
    try:
        return jax.devices()[0].device_kind.lower()
    except Exception:  # pragma: no cover - defensive
        return ""


def _num_tensorcores(device_kind: str) -> int:
    # v7x has 2 TensorCores per chip; v5e/v6e have 1.
    return 2 if ("v7" in device_kind or "7x" in device_kind) else 1


def _default_tile_rows(itemsize: int, device_kind: str) -> int:
    # Target per-input / per-pipeline-buffer block size.  2 inputs x 2 buffers
    # of this must stay inside the scoped-VMEM default (16 MiB v5e, 32 MiB
    # v6e/v7x), so: 2 MiB blocks on v5e (8 MiB total), 4 MiB on v6e/v7x (16 MiB).
    blk_bytes = (2 << 20) if "v5" in device_kind else (4 << 20)
    return max(_SUBLANES, blk_bytes // (_LANES * max(1, itemsize)))


def _make_reg_loss_kernel(loss_type: str, delta: float, rows: int,
                          tile_rows: int, blocks_per_split: int):
    """Build the elementwise-loss + partial-sum kernel for a given loss type."""

    def kernel(p_ref, t_ref, o_ref):
        c = pl.program_id(0)   # core-split index
        i = pl.program_id(1)   # row-block index within the split

        @pl.when(i == 0)
        def _():
            o_ref[...] = jnp.zeros_like(o_ref)

        d = p_ref[...].astype(jnp.float32) - t_ref[...].astype(jnp.float32)
        elt = _elementwise_loss(d, loss_type, delta)

        logical_block = c * blocks_per_split + i
        row0 = logical_block * tile_rows
        is_full = (row0 + tile_rows) <= rows

        # Full blocks (the overwhelming majority): plain (tile_rows,128)->(8,128)
        # fold with pure VPU adds -- no iota / compare / select on the hot path.
        @pl.when(is_full)
        def _():
            o_ref[...] += jnp.sum(elt.reshape(-1, _SUBLANES, _LANES), axis=0)

        # Ragged last block (and any clamped duplicate block when the grid is
        # split): mask rows past the true row count so padded/stale VMEM rows
        # contribute exactly zero.
        @pl.when(jnp.logical_not(is_full))
        def _():
            local_row = jax.lax.broadcasted_iota(jnp.int32, (tile_rows, 1), 0)
            masked = jnp.where((row0 + local_row) < rows, elt, 0.0)
            o_ref[...] += jnp.sum(masked.reshape(-1, _SUBLANES, _LANES), axis=0)

    return kernel


@functools.partial(jax.jit, static_argnames=("loss_type", "delta", "tile_rows"))
def reg_loss(pred, target, *, loss_type="mse", delta=1.0, tile_rows=None):
    """Pallas implementation of RegLoss.forward. Returns a scalar float32."""
    assert pred.shape == target.shape, "pred/target shapes must match"
    if loss_type not in ("mse", "mae", "huber"):
        raise ValueError("Unsupported loss type")
    if loss_type == "huber":
        assert delta > 0.0, "huber delta must be > 0"
    n = pred.size
    assert n > 0, "empty input"

    delta = float(delta)
    p = pred.reshape(-1)
    t = target.reshape(-1)

    # Tiny-input fast path: launch overhead dominates, use plain jnp.
    if n < _FAST_PATH_ELEMS:
        d = p.astype(jnp.float32) - t.astype(jnp.float32)
        return jnp.sum(_elementwise_loss(d, loss_type, delta)) / jnp.float32(n)

    # Split off the <128-element ragged tail instead of jnp.pad-ing both inputs
    # (which would re-materialize the full arrays in HBM before the kernel).
    rem = n % _LANES
    n_main = n - rem
    if rem:
        p_main, t_main = p[:n_main], t[:n_main]
    else:
        p_main, t_main = p, t

    rows = n_main // _LANES
    p2 = p_main.reshape(rows, _LANES)
    t2 = t_main.reshape(rows, _LANES)

    itemsize = min(jnp.dtype(pred.dtype).itemsize, jnp.dtype(target.dtype).itemsize)
    dk = _device_kind()
    if tile_rows is None:
        tile_rows = _default_tile_rows(itemsize, dk)

    # Sublane alignment for the second-to-last block dim (f32: 8, bf16: 16, 8-bit: 32).
    row_align = _SUBLANES * max(1, 4 // max(1, itemsize))
    tr = min(int(tile_rows), _round_up(rows, row_align))
    tr = _round_up(tr, row_align)

    nblocks = -(-rows // tr)
    # Only split across cores on multi-TC chips, and only if there is enough work.
    num_split = 2 if (_num_tensorcores(dk) >= 2 and nblocks >= 4) else 1
    bpc = -(-nblocks // num_split)  # row-blocks per split

    kernel = _make_reg_loss_kernel(loss_type, delta, rows, tr, bpc)

    def in_map(c, i):
        # Clamp so a split's extra iteration (when nblocks doesn't divide evenly)
        # re-reads the last valid block instead of DMA-ing out of bounds; its
        # contribution is masked to zero in-kernel.
        return (jnp.minimum(c * bpc + i, nblocks - 1), 0)

    if num_split >= 2:
        # CORE_PARALLEL actually shards the grid across v7x's two TensorCores;
        # plain "parallel" has no measurable codegen effect.
        split_sem = getattr(pltpu, "CORE_PARALLEL", "parallel")
    else:
        split_sem = "arbitrary"

    bytes_in = n_main * (jnp.dtype(pred.dtype).itemsize + jnp.dtype(target.dtype).itemsize)
    cost = pl.CostEstimate(
        flops=4 * n_main,
        transcendentals=0,
        bytes_accessed=bytes_in + num_split * _SUBLANES * _LANES * 4,
    )

    partial = pl.pallas_call(
        kernel,
        out_shape=jax.ShapeDtypeStruct((num_split * _SUBLANES, _LANES), jnp.float32),
        grid_spec=pltpu.PrefetchScalarGridSpec(
            num_scalar_prefetch=0,
            grid=(num_split, bpc),
            in_specs=[
                pl.BlockSpec((tr, _LANES), in_map),
                pl.BlockSpec((tr, _LANES), in_map),
            ],
            # Same block index across the i (reduction) axis -> VMEM-resident
            # accumulator; written back to HBM once at the end of each split.
            out_specs=pl.BlockSpec((_SUBLANES, _LANES), lambda c, i: (c, 0)),
        ),
        compiler_params=pltpu.CompilerParams(
            dimension_semantics=(split_sem, "arbitrary"),
        ),
        cost_estimate=cost,
    )(p2, t2)

    total = jnp.sum(partial)
    if rem:
        d_tail = p[n_main:].astype(jnp.float32) - t[n_main:].astype(jnp.float32)
        total = total + jnp.sum(_elementwise_loss(d_tail, loss_type, delta))

    # Single divide by the original element count.
    return total / jnp.float32(n)


def _reference(pred, target, loss_type, delta):
    d = pred.astype(jnp.float32) - target.astype(jnp.float32)
    if loss_type == "mse":
        return jnp.mean(d * d)
    if loss_type == "mae":
        return jnp.mean(jnp.abs(d))
    ad = jnp.abs(d)
    return jnp.mean(jnp.where(ad < delta, 0.5 * d * d / delta, ad - 0.5 * delta))


if __name__ == "__main__":
    key = jax.random.PRNGKey(0)
    kp, kt = jax.random.split(key)

    ok = True

    def check(pred, target, loss_type, delta=1.0, **kw):
        global ok
        out = jax.block_until_ready(
            reg_loss(pred, target, loss_type=loss_type, delta=delta, **kw))
        ref = _reference(pred, target, loss_type, delta)
        if not jnp.allclose(out, ref, rtol=1e-5, atol=1e-6):
            ok = False
            print(f"MISMATCH {loss_type} {pred.shape} {pred.dtype}: "
                  f"kernel={out} ref={ref}")

    # Small NCHW regression-map shapes, like a crop-yield head output.
    shape = (2, 4, 16, 16)
    pred = jax.random.normal(kp, shape, dtype=jnp.float32)
    target = jax.random.normal(kt, shape, dtype=jnp.float32) * 0.5

    for lt in ("mse", "mae", "huber"):
        check(pred, target, lt)

    # Force multiple row-blocks so the accumulate-across-i loop is exercised.
    check(pred, target, "mse", tile_rows=8)
    check(pred, target, "huber", delta=0.5, tile_rows=8)

    # Native bf16 path (no wrapper up-cast).
    check(pred.astype(jnp.bfloat16), target.astype(jnp.bfloat16), "huber")

    # numel not a multiple of 128: exercises the wrapper tail path and the
    # in-kernel masked (ragged) block.
    kp2, kt2 = jax.random.split(jax.random.PRNGKey(1))
    shape2 = (3, 5, 16, 17)  # 4080 elements -> 31 full rows + 112-elem tail
    pred2 = jax.random.normal(kp2, shape2, dtype=jnp.float32)
    target2 = jax.random.normal(kt2, shape2, dtype=jnp.float32) * 0.5
    check(pred2, target2, "mae")
    check(pred2, target2, "huber")

    # Tiny-input fast path (pure jnp, no pallas launch).
    check(pred[:1, :1, :4, :8], target[:1, :1, :4, :8], "mse")

    if ok:
        print("KERNEL_OK")
</pallas_src>

<mosaic_0001>
module attributes {stable_mosaic.version = 11 : i64} {
  func.func @kernel(%arg0: i32, %arg1: i32, %arg2: memref<16x128xf32, #tpu.memory_space<vmem>>, %arg3: memref<16x128xf32, #tpu.memory_space<vmem>>, %arg4: memref<8x128xf32, #tpu.memory_space<vmem>>) attributes {dimension_semantics = [#tpu.dimension_semantics<arbitrary>, #tpu.dimension_semantics<arbitrary>], iteration_bounds = array<i64: 1, 1>, scalar_prefetch = 0 : i64, scratch_operands = 0 : i64, tpu.core_type = #tpu.core_type<tc>, window_params = [{transform_indices = @transform_0, window_bounds = array<i64: 16, 128>}, {transform_indices = @transform_1, window_bounds = array<i64: 16, 128>}, {transform_indices = @transform_2, window_bounds = array<i64: 8, 128>}]} {
    %c0_i32 = arith.constant 0 : i32
    %0 = arith.cmpi eq, %arg1, %c0_i32 : i32
    %1 = arith.extui %0 : i1 to i32
    %c0_i32_0 = arith.constant 0 : i32
    %2 = arith.cmpi ne, %1, %c0_i32_0 : i32
    scf.if %2 {
      %cst = arith.constant 0.000000e+00 : f32
      %17 = vector.broadcast %cst : f32 to vector<8x128xf32>
      %c0_8 = arith.constant 0 : index
      %c0_9 = arith.constant 0 : index
      %18 = vector.load %arg4[%c0_8, %c0_9] : memref<8x128xf32, #tpu.memory_space<vmem>>, vector<8x128xf32>
      tpu.vector_store %arg4[%c0_8, %c0_9], %17 {strides = array<i32>} : memref<8x128xf32, #tpu.memory_space<vmem>>, vector<8x128xf32>,
    } else {
    }
    %c0 = arith.constant 0 : index
    %c0_1 = arith.constant 0 : index
    %3 = vector.load %arg2[%c0, %c0_1] : memref<16x128xf32, #tpu.memory_space<vmem>>, vector<16x128xf32>
    %c0_2 = arith.constant 0 : index
    %c0_3 = arith.constant 0 : index
    %4 = vector.load %arg3[%c0_2, %c0_3] : memref<16x128xf32, #tpu.memory_space<vmem>>, vector<16x128xf32>
    %5 = arith.subf %3, %4 : vector<16x128xf32>
    %6 = arith.mulf %5, %5 : vector<16x128xf32>
    %c1_i32 = arith.constant 1 : i32
    %7 = arith.muli %arg0, %c1_i32 : i32
    %8 = arith.addi %7, %arg1 : i32
    %c16_i32 = arith.constant 16 : i32
    %9 = arith.muli %8, %c16_i32 : i32
    %c16_i32_4 = arith.constant 16 : i32
    %10 = arith.addi %9, %c16_i32_4 : i32
    %c16_i32_5 = arith.constant 16 : i32
    %11 = arith.cmpi sle, %10, %c16_i32_5 : i32
    %12 = arith.extui %11 : i1 to i32
    %c0_i32_6 = arith.constant 0 : i32
    %13 = arith.cmpi ne, %12, %c0_i32_6 : i32
    scf.if %13 {
      %c0_8 = arith.constant 0 : index
      %c0_9 = arith.constant 0 : index
      %17 = vector.load %arg4[%c0_8, %c0_9] : memref<8x128xf32, #tpu.memory_space<vmem>>, vector<8x128xf32>
      %18 = vector.shape_cast %6 : vector<16x128xf32> to vector<2x8x128xf32>
      %cst = arith.constant dense<0.000000e+00> : vector<8x128xf32>
      %19 = vector.multi_reduction <add>, %18, %cst [0] : vector<2x8x128xf32> to vector<8x128xf32>
      %20 = arith.addf %17, %19 : vector<8x128xf32>
      %c0_10 = arith.constant 0 : index
      %c0_11 = arith.constant 0 : index
      %21 = vector.load %arg4[%c0_10, %c0_11] : memref<8x128xf32, #tpu.memory_space<vmem>>, vector<8x128xf32>
      tpu.vector_store %arg4[%c0_10, %c0_11], %20 {strides = array<i32>} : memref<8x128xf32, #tpu.memory_space<vmem>>, vector<8x128xf32>,
    } else {
    }
    %true = arith.constant true
    %14 = arith.xori %11, %true : i1
    %15 = arith.extui %14 : i1 to i32
    %c0_i32_7 = arith.constant 0 : i32
    %16 = arith.cmpi ne, %15, %c0_i32_7 : i32
    scf.if %16 {
      %17 = tpu.iota {dimensions = array<i32: 0>} : vector<16x1xi32>
      %18 = vector.broadcast %9 : i32 to vector<16x1xi32>
      %19 = arith.addi %18, %17 : vector<16x1xi32>
      %c16_i32_8 = arith.constant 16 : i32
      %20 = vector.broadcast %c16_i32_8 : i32 to vector<16x1xi32>
      %21 = arith.cmpi slt, %19, %20 : vector<16x1xi32>
      %cst = arith.constant 0.000000e+00 : f32
      %22 = vector.shape_cast %21 : vector<16x1xi1> to vector<16x1xi1>
      %23 = vector.broadcast %22 : vector<16x1xi1> to vector<16x128xi1>
      %24 = vector.broadcast %cst : f32 to vector<16x128xf32>
      %25 = arith.select %23, %6, %24 : vector<16x128xi1>, vector<16x128xf32>
      %c0_9 = arith.constant 0 : index
      %c0_10 = arith.constant 0 : index
      %26 = vector.load %arg4[%c0_9, %c0_10] : memref<8x128xf32, #tpu.memory_space<vmem>>, vector<8x128xf32>
      %27 = vector.shape_cast %25 : vector<16x128xf32> to vector<2x8x128xf32>
      %cst_11 = arith.constant dense<0.000000e+00> : vector<8x128xf32>
      %28 = vector.multi_reduction <add>, %27, %cst_11 [0] : vector<2x8x128xf32> to vector<8x128xf32>
      %29 = arith.addf %26, %28 : vector<8x128xf32>
      %c0_12 = arith.constant 0 : index
      %c0_13 = arith.constant 0 : index
      %30 = vector.load %arg4[%c0_12, %c0_13] : memref<8x128xf32, #tpu.memory_space<vmem>>, vector<8x128xf32>
      tpu.vector_store %arg4[%c0_12, %c0_13], %29 {strides = array<i32>} : memref<8x128xf32, #tpu.memory_space<vmem>>, vector<8x128xf32>,
    } else {
    }
    return
  }
  func.func @transform_0(%arg0: i32, %arg1: i32) -> (i32, i32) {
    %c1_i32 = arith.constant 1 : i32
    %0 = arith.muli %arg0, %c1_i32 : i32
    %1 = arith.addi %0, %arg1 : i32
    %c0_i32 = arith.constant 0 : i32
    %2 = arith.minsi %1, %c0_i32 : i32
    %c0_i32_0 = arith.constant 0 : i32
    %c0_i32_1 = arith.constant 0 : i32
    return %2, %c0_i32_0 : i32, i32
  }
  func.func @transform_1(%arg0: i32, %arg1: i32) -> (i32, i32) {
    %c1_i32 = arith.constant 1 : i32
    %0 = arith.muli %arg0, %c1_i32 : i32
    %1 = arith.addi %0, %arg1 : i32
    %c0_i32 = arith.constant 0 : i32
    %2 = arith.minsi %1, %c0_i32 : i32
    %c0_i32_0 = arith.constant 0 : i32
    %c0_i32_1 = arith.constant 0 : i32
    return %2, %c0_i32_0 : i32, i32
  }
  func.func @transform_2(%arg0: i32, %arg1: i32) -> (i32, i32) {
    %c0_i32 = arith.constant 0 : i32
    %c0_i32_0 = arith.constant 0 : i32
    return %arg0, %c0_i32 : i32, i32
  }
}

</mosaic_0001>

<bundles_post_ra>
// kernel: reg_loss.1
= control target key start
LH: loop header
LB: loop body
LE: loop exit
PB: predicated region body
PF: predicated region fallthrough
CT: control target
= control target key end

     0   :  { %s168_s0 = inlined_call_operand.vmem [shape: f32[16,128], index: 0, kind: input, shape index: {}]   ;;  %s169_s1 = inlined_call_operand.vmem [shape: f32[16,128], index: 1, kind: input, shape index: {}]   ;;  %s170_s2 = inlined_call_operand.vmem [shape: f32[8,128], index: 2, kind: output, shape index: {}]  }
   0x1   :  { %v80_v0 = vld [vmem:[%s168_s0] sm:$0xff]  ;;  %v81_v1 = vld [vmem:[%s168_s0 + $0x8] sm:$0xff] }
   0x2   :  { %v82_v2 = vld [vmem:[%s169_s1] sm:$0xff]  ;;  %v83_v3 = vld [vmem:[%s169_s1 + $0x8] sm:$0xff] }
   0x3   :  { %v84_v4 = vsub.f32 %v80_v0, %v82_v2  ;;  %v85_v5 = vsub.f32 %v81_v1, %v83_v3 }
   0x5   :  { %v86_v6 = vmul.f32 %v84_v4, %v84_v4  ;;  %v87_v7 = vmul.f32 %v85_v5, %v85_v5 }
   0x7   :  { %v96_v8 = vadd.f32 %v87_v7, %v86_v6 }
   0x9   :  { %98 = vst [vmem:[%s170_s2] sm:$0xff] %v96_v8 }

</bundles_post_ra>
